<compile_context>
chip_gen: v6e
topology: v6e:2x2x1
jax: 0.10.0
libtpu: 0.0.40
codegen_flags: <defaults>
</compile_context>

<pallas_src>
import functools

import jax
import jax.numpy as jnp
from jax.experimental import pallas as pl
from jax.experimental.pallas import tpu as pltpu


def _round_up(x: int, m: int) -> int:
    return ((x + m - 1) // m) * m


def _sublane_pack(dtype) -> int:
    # Sublane packing of the second-to-last dim: 8 rows for 4-byte dtypes,
    # 16 for 2-byte, 32 for 1-byte.
    return max(8, 32 // jnp.dtype(dtype).itemsize)


def _embed_kernel(*refs, ts: int, n_inner: int, pos_mode: str):
    """One (outer, inner) grid step = one (TS, D) tile of flattened tokens.

    pos_mode:
      "none"     — word embeddings only.
      "slice"    — default arange positions: contiguous auto-pipelined block.
      "resident" — explicit position_ids, position table resident in VMEM.
      "dma"      — explicit position_ids, position rows DMA-gathered from HBM.
    """
    if pos_mode == "none":
        ids_ref, word_hbm, out_ref, wbuf, wsem = refs
    elif pos_mode == "slice":
        ids_ref, word_hbm, pos_blk, out_ref, wbuf, wsem = refs
    elif pos_mode == "resident":
        ids_ref, pids_ref, word_hbm, pos_vmem, out_ref, wbuf, wsem, prow = refs
    else:  # "dma"
        (ids_ref, pids_ref, word_hbm, pos_hbm, out_ref,
         wbuf, wsem, pbuf, psem) = refs

    i = pl.program_id(1)                      # inner (sequential) index
    g = pl.program_id(0) * n_inner + i        # global tile index
    slot = i % 2                              # this tile's buffer slot
    nxt = 1 - slot                            # next tile's buffer slot

    def issue(idx_ref, hbm_ref, buf, sem, tile, dst_slot):
        base = tile * ts
        @pl.loop(0, ts)
        def _issue_row(t):
            row = idx_ref[base + t]
            pltpu.make_async_copy(hbm_ref.at[row], buf.at[dst_slot, t],
                                  sem.at[dst_slot]).start()

    def wait_slot(buf, sem, dst_slot):
        # DMA semaphores count bytes: one descriptor spanning the whole
        # (ts, D) slot consumes exactly the ts row copies issued into it.
        pltpu.make_async_copy(buf.at[1 - dst_slot], buf.at[dst_slot],
                              sem.at[dst_slot]).wait()

    # Prime the double buffer at the start of every inner sweep.
    @pl.when(i == 0)
    def _prime():
        issue(ids_ref, word_hbm, wbuf, wsem, g, slot)
        if pos_mode == "dma":
            issue(pids_ref, pos_hbm, pbuf, psem, g, slot)

    # Prefetch the next tile's rows so their latency hides behind this tile's
    # wait / compute / output writeback.
    if n_inner > 1:
        @pl.when(i + 1 < n_inner)
        def _prefetch():
            issue(ids_ref, word_hbm, wbuf, wsem, g + 1, nxt)
            if pos_mode == "dma":
                issue(pids_ref, pos_hbm, pbuf, psem, g + 1, nxt)

    if pos_mode == "resident":
        # On-chip gather from the VMEM-resident position table; runs while the
        # word-row DMAs are still in flight.
        base = g * ts
        @pl.loop(0, ts)
        def _gather_pos(t):
            pid = pids_ref[base + t]
            prow[pl.ds(t, 1), :] = pos_vmem[pl.ds(pid, 1), :]

    wait_slot(wbuf, wsem, slot)
    emb = wbuf[slot]

    if pos_mode == "slice":
        emb = emb + pos_blk[...].astype(emb.dtype)
    elif pos_mode == "resident":
        emb = emb + prow[...].astype(emb.dtype)
    elif pos_mode == "dma":
        wait_slot(pbuf, psem, slot)
        emb = emb + pbuf[slot].astype(emb.dtype)

    out_ref[...] = emb.astype(out_ref.dtype)


def parallel_embeddings_forward(input_ids,
                                word_table,
                                pos_table=None,
                                max_position_embeddings=0,
                                position_ids=None,
                                combine_batch_seqlen_dim=False,
                                seq_tile=128,
                                pos_resident_budget=4 * 1024 * 1024):
    """Single-device (world_size == 1) ParallelEmbeddings.forward."""
    B, S = input_ids.shape
    V, D = word_table.shape
    out_dtype = word_table.dtype
    w_item = jnp.dtype(out_dtype).itemsize
    add_pos = (max_position_embeddings > 0) and (pos_table is not None)

    # --- position mode selection (independent of tiling) ------------------
    if not add_pos:
        pos_mode, P, p_item = "none", 0, 0
    else:
        P = pos_table.shape[0]
        p_item = jnp.dtype(pos_table.dtype).itemsize
        if position_ids is None:
            pos_mode = "slice"          # arange positions == contiguous slice
        else:
            pos_mode = ("resident" if P * D * p_item <= pos_resident_budget
                        else "dma")

    # --- sequence tile: sublane aligned, VMEM budgeted ---------------------
    pack = _sublane_pack(out_dtype)
    if add_pos:
        pack = max(pack, _sublane_pack(pos_table.dtype))
    ts = min(max(seq_tile, pack), _round_up(S, pack))
    ts = _round_up(ts, pack)

    def vmem_est(ts_):
        est = 2 * ts_ * D * w_item          # wbuf (double-buffered gather)
        est += 2 * ts_ * D * w_item         # output block (auto double-buffered)
        if pos_mode == "slice":
            est += 2 * ts_ * D * p_item
        elif pos_mode == "resident":
            est += 2 * P * D * p_item + ts_ * D * p_item
        elif pos_mode == "dma":
            est += 2 * ts_ * D * p_item
        return est

    budget = 40 * 1024 * 1024   # stay well under v7x's 64 MiB per-core VMEM
    while vmem_est(ts) > budget and ts > pack:
        ts = max(pack, _round_up(ts // 2, pack))

    s_pad = _round_up(S, ts)
    n_s_tiles = s_pad // ts
    total_tiles = B * n_s_tiles
    # Split flattened tiles over (outer parallel, inner arbitrary) so v7x's
    # two TensorCores each get a balanced, independently primed inner sweep.
    n_outer = 2 if (total_tiles % 2 == 0 and total_tiles >= 2) else 1
    n_inner = total_tiles // n_outer

    # --- ids: flatten to 1-D for SMEM scalar prefetch ----------------------
    # TODO(synk): torch nn.Embedding raises on out-of-range ids; we clamp.
    ids = jnp.clip(input_ids.astype(jnp.int32), 0, V - 1)
    if s_pad != S:
        ids = jnp.pad(ids, ((0, 0), (0, s_pad - S)))
    args = [ids.reshape(-1)]
    num_prefetch = 1

    if pos_mode in ("resident", "dma"):
        pids = jnp.clip(position_ids.astype(jnp.int32), 0, P - 1)
        if s_pad != S:
            pids = jnp.pad(pids, ((0, 0), (0, s_pad - S)))
        args.append(pids.reshape(-1))
        num_prefetch = 2

    # --- specs --------------------------------------------------------------
    in_specs = [pl.BlockSpec(memory_space=pl.ANY)]        # word table in HBM
    table_args = [word_table]
    scratch = [pltpu.VMEM((2, ts, D), out_dtype),          # wbuf
               pltpu.SemaphoreType.DMA((2,))]              # wsem

    if pos_mode == "slice":
        if P >= s_pad:
            pos_in = pos_table[:s_pad]
        else:
            # TODO(synk): torch errors when seqlen > max_position_embeddings;
            # here out-of-range default positions read zeros instead.
            pos_in = jnp.pad(pos_table, ((0, s_pad - P), (0, 0)))
        in_specs.append(pl.BlockSpec(
            (ts, D), lambda o, i, *_: ((o * n_inner + i) % n_s_tiles, 0)))
        table_args.append(pos_in)
    elif pos_mode == "resident":
        in_specs.append(pl.BlockSpec((P, D), lambda o, i, *_: (0, 0)))
        table_args.append(pos_table)
        scratch.append(pltpu.VMEM((ts, D), pos_table.dtype))   # prow
    elif pos_mode == "dma":
        in_specs.append(pl.BlockSpec(memory_space=pl.ANY))      # pos table HBM
        table_args.append(pos_table)
        scratch += [pltpu.VMEM((2, ts, D), pos_table.dtype),    # pbuf
                    pltpu.SemaphoreType.DMA((2,))]              # psem

    out_spec = pl.BlockSpec((ts, D), lambda o, i, *_: (o * n_inner + i, 0))

    kernel = functools.partial(_embed_kernel, ts=ts, n_inner=n_inner,
                               pos_mode=pos_mode)
    vmem_limit = int(min(64 * 1024 * 1024,
                         max(32 * 1024 * 1024,
                             vmem_est(ts) + 8 * 1024 * 1024)))

    out = pl.pallas_call(
        kernel,
        out_shape=jax.ShapeDtypeStruct((B * s_pad, D), out_dtype),
        grid_spec=pltpu.PrefetchScalarGridSpec(
            num_scalar_prefetch=num_prefetch,
            grid=(n_outer, n_inner),
            in_specs=in_specs,
            out_specs=out_spec,
            scratch_shapes=scratch),
        compiler_params=pltpu.CompilerParams(
            dimension_semantics=("parallel", "arbitrary"),
            vmem_limit_bytes=vmem_limit),
    )(*args, *table_args)

    out = out.reshape(B, s_pad, D)
    if s_pad != S:
        out = out[:, :S, :]
    if combine_batch_seqlen_dim:
        out = out.reshape(B * S, D)
    return out


if __name__ == "__main__":
    batch, seqlen = 2, 8
    embed_dim = 128
    vocab_size = 64
    max_position_embeddings = 16

    key = jax.random.PRNGKey(0)
    k_word, k_pos, k_ids, k_ids2 = jax.random.split(key, 4)

    # nn.Embedding default init: N(0, 1).
    word_table = jax.random.normal(k_word, (vocab_size, embed_dim), jnp.float32)
    pos_table = jax.random.normal(k_pos, (max_position_embeddings, embed_dim),
                                  jnp.float32)
    input_ids = jax.random.randint(k_ids, (batch, seqlen), 0, vocab_size,
                                   dtype=jnp.int32)

    # 1) Default positions (arange fast path: contiguous pos slice + VPU add).
    out = jax.block_until_ready(parallel_embeddings_forward(
        input_ids, word_table, pos_table, max_position_embeddings))
    ref = (jnp.take(word_table, input_ids, axis=0)
           + jnp.take(pos_table, jnp.arange(seqlen), axis=0)[None, :, :])
    assert out.shape == (batch, seqlen, embed_dim)
    assert jnp.allclose(out, ref, atol=1e-5, rtol=1e-5)

    # 2) Explicit position_ids (VMEM-resident pos table) + combined (b s) dim.
    pos_ids = jnp.broadcast_to(
        jnp.arange(seqlen, dtype=jnp.int32)[::-1][None, :], (batch, seqlen))
    out2 = jax.block_until_ready(parallel_embeddings_forward(
        input_ids, word_table, pos_table, max_position_embeddings,
        position_ids=pos_ids, combine_batch_seqlen_dim=True))
    ref2 = (jnp.take(word_table, input_ids, axis=0)
            + jnp.take(pos_table, pos_ids, axis=0)
            ).reshape(batch * seqlen, embed_dim)
    assert out2.shape == (batch * seqlen, embed_dim)
    assert jnp.allclose(out2, ref2, atol=1e-5, rtol=1e-5)

    # 3) Explicit position_ids, DMA-gather fallback forced (budget = 0).
    out3 = jax.block_until_ready(parallel_embeddings_forward(
        input_ids, word_table, pos_table, max_position_embeddings,
        position_ids=pos_ids, pos_resident_budget=0))
    ref3 = (jnp.take(word_table, input_ids, axis=0)
            + jnp.take(pos_table, pos_ids, axis=0))
    assert jnp.allclose(out3, ref3, atol=1e-5, rtol=1e-5)

    # 4) No position embeddings, bf16 table, seqlen not tile-aligned (tail pad).
    seqlen2 = 12
    word_bf16 = word_table.astype(jnp.bfloat16)
    input_ids2 = jax.random.randint(k_ids2, (batch, seqlen2), 0, vocab_size,
                                    dtype=jnp.int32)
    out4 = jax.block_until_ready(parallel_embeddings_forward(
        input_ids2, word_bf16, None, 0))
    ref4 = jnp.take(word_bf16, input_ids2, axis=0)
    assert out4.shape == (batch, seqlen2, embed_dim)
    assert out4.dtype == jnp.bfloat16
    assert jnp.allclose(out4.astype(jnp.float32), ref4.astype(jnp.float32),
                        atol=1e-2, rtol=1e-2)

    # 5) Default positions with a non-tile-aligned seqlen (slice path + tail).
    out5 = jax.block_until_ready(parallel_embeddings_forward(
        input_ids2, word_table, pos_table, max_position_embeddings))
    ref5 = (jnp.take(word_table, input_ids2, axis=0)
            + jnp.take(pos_table, jnp.arange(seqlen2), axis=0)[None, :, :])
    assert out5.shape == (batch, seqlen2, embed_dim)
    assert jnp.allclose(out5, ref5, atol=1e-5, rtol=1e-5)

    print("KERNEL_OK")
</pallas_src>

<mosaic_0001>
module attributes {stable_mosaic.version = 11 : i64} {
  func.func @_embed_kernel(%arg0: i32, %arg1: i32, %arg2: memref<16xi32, #tpu.memory_space<smem>>, %arg3: memref<64x128xf32, #tpu.memory_space<any>>, %arg4: memref<8x128xf32, #tpu.memory_space<vmem>>, %arg5: memref<8x128xf32, #tpu.memory_space<vmem>>, %arg6: memref<2x8x128xf32, #tpu.memory_space<vmem>>, %arg7: memref<2x!tpu.dma_semaphore, #tpu.memory_space<semaphore_mem>>) attributes {dimension_semantics = [#tpu.dimension_semantics<parallel>, #tpu.dimension_semantics<arbitrary>], iteration_bounds = array<i64: 2, 1>, scalar_prefetch = 1 : i64, scratch_operands = 2 : i64, tpu.core_type = #tpu.core_type<tc>, window_params = [{}, {transform_indices = @transform_1, window_bounds = array<i64: 8, 128>}, {transform_indices = @transform_2, window_bounds = array<i64: 8, 128>}]} {
    %c1_i32 = arith.constant 1 : i32
    %0 = arith.muli %arg0, %c1_i32 : i32
    %1 = arith.addi %0, %arg1 : i32
    %c2_i32 = arith.constant 2 : i32
    %c0_i32 = arith.constant 0 : i32
    %2 = arith.cmpi eq, %c2_i32, %c0_i32 : i32
    %c1_i32_0 = arith.constant 1 : i32
    %3 = arith.select %2, %c1_i32_0, %c2_i32 : i32
    %4 = arith.remsi %arg1, %3 : i32
    %c0_i32_1 = arith.constant 0 : i32
    %5 = arith.cmpi ne, %4, %c0_i32_1 : i32
    %c0_i32_2 = arith.constant 0 : i32
    %6 = arith.cmpi slt, %4, %c0_i32_2 : i32
    %c0_i32_3 = arith.constant 0 : i32
    %7 = arith.cmpi slt, %3, %c0_i32_3 : i32
    %8 = arith.xori %6, %7 : i1
    %9 = arith.andi %8, %5 : i1
    %10 = arith.addi %4, %3 : i32
    %11 = arith.select %9, %10, %4 : i32
    %c0_i32_4 = arith.constant 0 : i32
    %12 = arith.cmpi eq, %arg1, %c0_i32_4 : i32
    %13 = arith.extui %12 : i1 to i32
    %c0_i32_5 = arith.constant 0 : i32
    %14 = arith.cmpi ne, %13, %c0_i32_5 : i32
    scf.if %14 {
      %c8_i32 = arith.constant 8 : i32
      %28 = arith.muli %1, %c8_i32 : i32
      %c0_i32_16 = arith.constant 0 : i32
      %c8_i32_17 = arith.constant 8 : i32
      %29 = arith.addi %c0_i32_16, %c8_i32_17 : i32
      %c1_i32_18 = arith.constant 1 : i32
      scf.for %arg8 = %c0_i32_16 to %29 step %c1_i32_18  : i32 {
        %c1_i32_20 = arith.constant 1 : i32
        %30 = arith.muli %arg8, %c1_i32_20 : i32
        %c0_i32_21 = arith.constant 0 : i32
        %31 = arith.addi %c0_i32_21, %30 : i32
        %32 = arith.addi %28, %31 : i32
        %33 = arith.index_cast %32 : i32 to index
        %34 = memref.load %arg2[%33] : memref<16xi32, #tpu.memory_space<smem>>
        %c0_i32_22 = arith.constant 0 : i32
        %35 = tpu.memref_slice %arg3[%34, %c0_i32_22] : memref<64x128xf32, #tpu.memory_space<any>> -> memref<1x128xf32, #tpu.memory_space<any>>
        %36 = tpu.memref_squeeze %35 : memref<1x128xf32, #tpu.memory_space<any>> -> memref<128xf32, #tpu.memory_space<any>>
        %c0_i32_23 = arith.constant 0 : i32
        %37 = tpu.memref_slice %arg6[%11, %31, %c0_i32_23] : memref<2x8x128xf32, #tpu.memory_space<vmem>> -> memref<1x1x128xf32, #tpu.memory_space<vmem>>
        %38 = tpu.memref_squeeze %37 : memref<1x1x128xf32, #tpu.memory_space<vmem>> -> memref<128xf32, #tpu.memory_space<vmem>>
        %39 = tpu.memref_slice %arg7[%11] : memref<2x!tpu.dma_semaphore, #tpu.memory_space<semaphore_mem>> -> memref<1x!tpu.dma_semaphore, #tpu.memory_space<semaphore_mem>>
        %40 = tpu.memref_squeeze %39 : memref<1x!tpu.dma_semaphore, #tpu.memory_space<semaphore_mem>> -> memref<!tpu.dma_semaphore, #tpu.memory_space<semaphore_mem>>
        tpu.enqueue_dma source(%36 : memref<128xf32, #tpu.memory_space<any>>) target(%38 : memref<128xf32, #tpu.memory_space<vmem>>) target_semaphore(%40 : memref<!tpu.dma_semaphore, #tpu.memory_space<semaphore_mem>>)
      }
      %c8_i32_19 = arith.constant 8 : i32
    } else {
    }
    %c1_i32_6 = arith.constant 1 : i32
    %15 = arith.subi %c1_i32_6, %11 : i32
    %c0_i32_7 = arith.constant 0 : i32
    %c0_i32_8 = arith.constant 0 : i32
    %16 = tpu.memref_slice %arg6[%15, %c0_i32_7, %c0_i32_8] : memref<2x8x128xf32, #tpu.memory_space<vmem>> -> memref<1x8x128xf32, #tpu.memory_space<vmem>>
    %17 = tpu.memref_squeeze %16 : memref<1x8x128xf32, #tpu.memory_space<vmem>> -> memref<8x128xf32, #tpu.memory_space<vmem>>
    %c0_i32_9 = arith.constant 0 : i32
    %c0_i32_10 = arith.constant 0 : i32
    %18 = tpu.memref_slice %arg6[%11, %c0_i32_9, %c0_i32_10] : memref<2x8x128xf32, #tpu.memory_space<vmem>> -> memref<1x8x128xf32, #tpu.memory_space<vmem>>
    %19 = tpu.memref_squeeze %18 : memref<1x8x128xf32, #tpu.memory_space<vmem>> -> memref<8x128xf32, #tpu.memory_space<vmem>>
    %20 = tpu.memref_slice %arg7[%11] : memref<2x!tpu.dma_semaphore, #tpu.memory_space<semaphore_mem>> -> memref<1x!tpu.dma_semaphore, #tpu.memory_space<semaphore_mem>>
    %21 = tpu.memref_squeeze %20 : memref<1x!tpu.dma_semaphore, #tpu.memory_space<semaphore_mem>> -> memref<!tpu.dma_semaphore, #tpu.memory_space<semaphore_mem>>
    tpu.wait_dma2 semaphore(%21 : memref<!tpu.dma_semaphore, #tpu.memory_space<semaphore_mem>>) src(%17 : memref<8x128xf32, #tpu.memory_space<vmem>>) dst(%19 : memref<8x128xf32, #tpu.memory_space<vmem>>)
    %22 = arith.index_cast %11 : i32 to index
    %c0 = arith.constant 0 : index
    %c0_11 = arith.constant 0 : index
    %23 = vector.load %arg6[%22, %c0, %c0_11] : memref<2x8x128xf32, #tpu.memory_space<vmem>>, vector<1x8x128xf32>
    %24 = vector.shape_cast %23 : vector<1x8x128xf32> to vector<8x128xf32>
    %c0_12 = arith.constant 0 : index
    %c0_13 = arith.constant 0 : index
    %25 = vector.load %arg4[%c0_12, %c0_13] : memref<8x128xf32, #tpu.memory_space<vmem>>, vector<8x128xf32>
    %26 = arith.addf %24, %25 : vector<8x128xf32>
    %c0_14 = arith.constant 0 : index
    %c0_15 = arith.constant 0 : index
    %27 = vector.load %arg5[%c0_14, %c0_15] : memref<8x128xf32, #tpu.memory_space<vmem>>, vector<8x128xf32>
    tpu.vector_store %arg5[%c0_14, %c0_15], %26 {strides = array<i32>} : memref<8x128xf32, #tpu.memory_space<vmem>>, vector<8x128xf32>,
    return
  }
  func.func @transform_1(%arg0: i32, %arg1: i32, %arg2: memref<16xi32, #tpu.memory_space<smem>>) -> (i32, i32) {
    %c1_i32 = arith.constant 1 : i32
    %0 = arith.muli %arg0, %c1_i32 : i32
    %1 = arith.addi %0, %arg1 : i32
    %c1_i32_0 = arith.constant 1 : i32
    %c0_i32 = arith.constant 0 : i32
    %2 = arith.cmpi eq, %c1_i32_0, %c0_i32 : i32
    %c1_i32_1 = arith.constant 1 : i32
    %3 = arith.select %2, %c1_i32_1, %c1_i32_0 : i32
    %4 = arith.remsi %1, %3 : i32
    %c0_i32_2 = arith.constant 0 : i32
    %5 = arith.cmpi ne, %4, %c0_i32_2 : i32
    %c0_i32_3 = arith.constant 0 : i32
    %6 = arith.cmpi slt, %4, %c0_i32_3 : i32
    %c0_i32_4 = arith.constant 0 : i32
    %7 = arith.cmpi slt, %3, %c0_i32_4 : i32
    %8 = arith.xori %6, %7 : i1
    %9 = arith.andi %8, %5 : i1
    %10 = arith.addi %4, %3 : i32
    %11 = arith.select %9, %10, %4 : i32
    %c0_i32_5 = arith.constant 0 : i32
    %c0_i32_6 = arith.constant 0 : i32
    return %11, %c0_i32_5 : i32, i32
  }
  func.func @transform_2(%arg0: i32, %arg1: i32, %arg2: memref<16xi32, #tpu.memory_space<smem>>) -> (i32, i32) {
    %c1_i32 = arith.constant 1 : i32
    %0 = arith.muli %arg0, %c1_i32 : i32
    %1 = arith.addi %0, %arg1 : i32
    %c0_i32 = arith.constant 0 : i32
    %c0_i32_0 = arith.constant 0 : i32
    return %1, %c0_i32 : i32, i32
  }
}

</mosaic_0001>

<bundles_post_ra>
// kernel: tpu_custom_call.1
= control target key start
LH: loop header
LB: loop body
LE: loop exit
PB: predicated region body
PF: predicated region fallthrough
CT: control target
= control target key end

     0   :  { %s532_s12 = smov [#allocation5]   ;;  %s707_s0 = inlined_call_operand.hbm [shape: s32[16], index: 0, kind: input, shape index: {}]   ;;  %s708_s1 = inlined_call_operand.hbm [shape: f32[64,128], index: 1, kind: input, shape index: {}]   ;;  %s709_s2 = inlined_call_operand.hbm [shape: f32[8,128], index: 2, kind: input, shape index: {}]   ;;  %s710_s3 = inlined_call_operand.hbm [shape: f32[16,128], index: 3, kind: output, shape index: {}]  }
   0x1   :  { %9 = dma.hbm_to_smem %s707_s0, 16, %s532_s12, [#allocation4] }
   0x2   :  { %492 = dma.done.wait [#allocation4], 16 }
   0x3   :  { %493 = vsyncadd [#allocation4], 4294967280 }
   0x4   :  { %11 = sfence }
   0x5   :  { %12 = vsyncpa [#allocation7], 0 }
   0x6   :  { %13 = vsyncpa [#allocation8], 0 }
   0x7   :  { %15 = vsyncpa [#allocation8 + $0x1], 0  ;;  %s559_s15 = smov 0   ;;  %s561_s16 = smov 0  }
   0x8   :  { %s563_s17 = smov 0   ;;  %s565_s18 = smov 0  }
   0x9   :  { %s567_s19 = smov 0   ;;  %s569_s20 = smov 0  }
   0xa LB: > { %s292_s0 = sadd.s32 4294967295, %s526_s20   ;;  %s293_s21 = sadd.s32 4294967294, %s526_s20   ;;  %s526_s20 = sphi %s569_s20, %s21_s20   ;;  %s522_s19 = sphi %s567_s19, %s721_s19   ;;  %s518_s18 = sphi %s565_s18, %s720_s18   ;;  %s514_s17 = sphi %s563_s17, %s719_s17   ;;  %s510_s16 = sphi %s561_s16, %s718_s16   ;;  %s506_s15 = sphi %s559_s15, %s717_s15  }
   0xb   : > { %s33_s22 = sadd.s32 1, %s522_s19  ;;  %s63_s23 = sadd.s32 1, %s514_s17 }
   0xc   : > { %p35_p0 = scmp.ge.s32.totalorder %s33_s22, 2  ;;  %p73_p1 = scmp.ne.s32.totalorder %s514_s17, %s510_s16 }
   0xd   : > { %p74_p2 = scmp.eq.s32.totalorder %s292_s0, 1  ;;  %p79_p3 = scmp.ne.s32.totalorder %s510_s16, %s506_s15 }
   0xe   : > { %s723_s22 = smov (%p35_p0, %s33_s22), 0  ;;  %p80_p5 = scmp.eq.s32.totalorder %s293_s21, 1 }
   0xf   : > { %p599_p4 = por %p74_p2, %p73_p1  ;;  %s60_s25 = ssub.s32 %s522_s19, %s723_s22 }
  0x10   : > { %p294_p6 = scmp.ge.s32.totalorder %s526_s20, 1  ;;  %p61_p7 = scmp.eq.s32.totalorder %s60_s25, 0 }
  0x11   : > { %p606_p8 = por %p80_p5, %p79_p3  ;;  %p87_p9 = scmp.lt.s32.totalorder %s526_s20, 3 }
  0x12   : > { %s612_s27 = scalar_select %p61_p7, %s514_s17, %s63_s23  }
  0x13   : > { %p614_p10 = pnand %p294_p6, %p87_p9  ;;  %p618_p11 = scmp.eq.s32.totalorder %s292_s0, 0 }
  0x14   : > { %s533_s30 = smov [#allocation6]  }
  0x15   : > { %p313_p12 = pneg %p614_p10  ;;  %s100_s4 = sshll.u32 %s533_s30, 4  ;;  %s101_s4 = int_to_ptr.vmem [resolvable:$true] %s100_s4 }
  0x16   : > { %s401_s5 = scalar_lea.vmem %s101_s4, 128  ;;  %p409_p5 = scmp.lt.s32.totalorder %s101_s4, %s101_s4 }
  0x17   : > { %p314_p13 = pnand %p618_p11, %p313_p12  ;;  %p402_p1 = scmp.ne.s32.totalorder %s101_s4, %s401_s5 }
  0x18   : > { %p410_p6 = scmp.lt.s32.totalorder %s401_s5, %s401_s5 }
  0x19   : > { %p392_p0 = pneg %p314_p13 }
  0x1a   : > { %p411_p7 = por %p410_p6, %p409_p5 }
  0x1b   : > { %p404_p2 = pnand %p402_p1, %p392_p0 }
  0x1d   : > { %p405_p3 = pneg %p404_p2 }
  0x1f   : > { %p412_p9 = pnand %p411_p7, %p405_p3 }
  0x21   : > { %415 = shalt.err (!%p412_p9)
}
  0x22   : > { %316 = dma.hbm_to_vmem [thread:$0]  (!%p314_p13), %s709_s2, 128, %s101_s4, [#allocation7]  }
  0x23   : > { %113 = sbr.rel (%p614_p10) target bundleno = 105 (0x69), region = 24 }
  0x28   : > { %495 = dma.done.wait (%p618_p11), [#allocation7], 128  }
  0x29   : > { %497 = vsyncadd (%p618_p11), [#allocation7], 4294967168  ;;  %s711_s8 = sand.u32 1, %s510_s16   ;;  %s299_s9 = sshll.u32 %s518_s18, 3 }
  0x2a   : > { %s639_s10 = sshll.u32 %s711_s8, 3  ;;  %s642_s12 = smov 0  }
  0x2b   : > { %s127_s11 = scalar_lea.vmem [#allocation9], %s639_s10 }
  0x2c LB: >> { %s153_s13 = sadd.s32 %s530_s12, %s299_s9  ;;  %s159_s0 = scalar_lea.vmem [#allocation2], %s530_s12  ;;  %s530_s12 = sphi %s642_s12, %s152_s12  }
  0x2d   : >> { %s154_s14 = sld [smem:[#allocation5 + %s153_s13]]  ;;  %s168_s21 = sshll.u32 %s159_s0, 4  ;;  %s169_s21 = int_to_ptr.vmem [resolvable:$true] %s168_s21 }
  0x2e   : >> { %s418_s6 = scalar_lea.hbm %s708_s1, 1024 }
  0x33   : >> { %s300_s23 = sshll.u32 %s154_s14, 4 }
  0x34   : >> { %s156_s29 = scalar_lea.hbm %s708_s1, %s300_s23 }
  0x35   : >> { %s416_s30 = scalar_lea.hbm %s156_s29, 16  ;;  %p419_p11 = scmp.lt.s32.totalorder %s156_s29, %s708_s1 }
  0x36   : >> { %p417_p10 = scmp.ne.s32.totalorder %s156_s29, %s416_s30  ;;  %p420_p12 = scmp.lt.s32.totalorder %s418_s6, %s416_s30 }
  0x38   : >> { %p421_p13 = por %p420_p12, %p419_p11 }
  0x3a   : >> { %p422_p0 = pnand %p421_p13, %p417_p10 }
  0x3c   : >> { %425 = shalt.err (!%p422_p0)  }
  0x3d   : >> { %s426_s13 = scalar_lea.vmem %s169_s21, 16  ;;  %s534_s14 = smov [#allocation2]  }
  0x3e   : >> { %p427_p1 = scmp.ne.s32.totalorder %s169_s21, %s426_s13  ;;  %s428_s0 = sshll.u32 %s534_s14, 4  ;;  %s429_s0 = int_to_ptr.vmem [resolvable:$false] %s428_s0 }
  0x3f   : >> { %s430_s23 = scalar_lea.vmem %s429_s0, 256  ;;  %p431_p2 = scmp.lt.s32.totalorder %s169_s21, %s429_s0 }
  0x40   : >> { %p432_p3 = scmp.lt.s32.totalorder %s430_s23, %s426_s13 }
  0x42   : >> { %p433_p5 = por %p432_p3, %p431_p2 }
  0x44   : >> { %p434_p6 = pnand %p433_p5, %p427_p1 }
  0x46   : >> { %437 = shalt.err (!%p434_p6)  }
  0x47   : >> { %171 = dma.hbm_to_vmem [thread:$0]  %s156_s29, 16, %s169_s21, [#allocation3] }
  0x48   : >> { %s152_s12 = sadd.s32 1, %s530_s12  }
  0x49   : >> { %p149_p7 = scmp.ge.s32.totalorder %s152_s12, 8  }
  0x4b   : > { %151 = sbr.rel (!%p149_p7) target bundleno = 44 (0x2c), region = 82 }
  0x50   : > { %498 = dma.done.wait [#allocation3], 128 }
  0x51   : > { %499 = vsyncadd [#allocation3], 4294967168  ;;  %s302_s8 = sshll.u32 %s518_s18, 7  ;;  %s197_s25 = sshll.u32 %s127_s11, 4  ;;  %v178_v0 = vld [vmem:[#allocation2] sm:$0xff]  ;;  %v179_v1 = vld [vmem:[#allocation6] sm:$0xff]  ;;  %s198_s25 = int_to_ptr.vmem [resolvable:$true] %s197_s25 }
  0x52   : > { %v180_v2 = vadd.f32 %v179_v1, %v178_v0  ;;  %s195_s29 = scalar_lea.hbm %s710_s3, %s302_s8  ;;  %s716_s9 = sand.u32 1, %s510_s16  }
  0x53   : > { %s183_s12 = scalar_lea.sflag [#allocation8], %s716_s9  ;;  %s438_s30 = scalar_lea.vmem %s198_s25, 128 }
  0x54   : > { %181 = vst [vmem:[%s127_s11] sm:$0xff] %v180_v2  ;;  %p439_p9 = scmp.ne.s32.totalorder %s198_s25, %s438_s30  ;;  %s535_s18 = smov [#allocation9]  }
  0x55   : > { %s442_s4 = sshll.u32 %s535_s18, 4  ;;  %s443_s4 = int_to_ptr.vmem [resolvable:$false] %s442_s4 }
  0x56   : > { %p440_p10 = pnand %p439_p9, %p599_p4  ;;  %s444_s5 = scalar_lea.vmem %s443_s4, 256 }
  0x57   : > { %p445_p12 = scmp.lt.s32.totalorder %s198_s25, %s443_s4  ;;  %p446_p13 = scmp.lt.s32.totalorder %s444_s5, %s438_s30 }
  0x58   : > { %p441_p11 = pneg %p440_p10 }
  0x59   : > { %p447_p0 = por %p446_p13, %p445_p12 }
  0x5b   : > { %p448_p1 = pnand %p447_p0, %p441_p11 }
  0x5d   : > { %451 = shalt.err (!%p448_p1)
}
  0x5e   : > { %s452_s6 = scalar_lea.hbm %s195_s29, 128  ;;  %s456_s7 = scalar_lea.hbm %s710_s3, 256 }
  0x5f   : > { %p453_p2 = scmp.ne.s32.totalorder %s195_s29, %s452_s6  ;;  %p457_p6 = scmp.lt.s32.totalorder %s195_s29, %s710_s3 }
  0x60   : > { %p458_p7 = scmp.lt.s32.totalorder %s456_s7, %s452_s6 }
  0x61   : > { %p454_p3 = pnand %p453_p2, %p599_p4 }
  0x62   : > { %p459_p9 = por %p458_p7, %p457_p6 }
  0x63   : > { %p455_p5 = pneg %p454_p3 }
  0x65   : > { %p460_p10 = pnand %p459_p9, %p455_p5 }
  0x67   : > { %463 = shalt.err (!%p460_p10)
}
  0x68   : > { %311 = dma.vmem_to_hbm [thread:$0]  (%p599_p4), %s198_s25, 128, %s195_s29, %s183_s12  }
  0x69 PF: > { %p323_p11 = scmp.ge.s32.totalorder %s526_s20, 2  ;;  %s209_s0 = sand.u32 1, %s506_s15  }
  0x6a   : > { %s210_s23 = scalar_lea.sflag [#allocation8], %s209_s0 }
  0x6b   : > { %p318_p12 = pnand %p323_p11, %p606_p8 }
  0x6d   : > { %p319_p13 = pneg %p318_p12 }
  0x6f   : > { %501 = dma.done.wait (%p319_p13), %s210_s23, 128  }
  0x70   : > { %503 = vsyncadd (%p319_p13), %s210_s23, 4294967168  ;;  %s21_s20 = sadd.s32 1, %s526_s20   ;;  %s717_s15 = smov %s510_s16 }
  0x71   : > { %p18_p0 = scmp.ge.s32.totalorder %s21_s20, 4   ;;  %s718_s16 = smov %s514_s17 }
  0x72   : > { %s719_s17 = smov %s612_s27  ;;  %s720_s18 = smov %s522_s19 }
  0x73   : > { %s721_s19 = smov %s723_s22  ;;  %20 = sbr.rel (!%p18_p0) target bundleno = 10 (0xa), region = 93 }
  0x78   :  { %215 = vsyncpa [#allocation7], 1 }
  0x79   :  { %217 = vsyncpa [#allocation7 + $0x1], 1 }
  0x7a   :  { %218 = vsyncpa [#allocation8], 1 }
  0x7b   :  { %220 = vsyncpa [#allocation8 + $0x1], 1 }
  0x7c   :  { %221 = vsyncmov [#allocation3] }
  0x7f   :  { %s222_s24 = vpop.sfrf %221 }
  0x80   :  { %p305_p4 = scmp.ne.s32.totalorder %s222_s24, 0 }
  0x82   :  { %226 = shalt.err (%p305_p4)  }
  0x83   :  { %228 = vsyncmov [#allocation3 + $0x1] }
  0x86   :  { %s229_s26 = vpop.sfrf %228 }
  0x87   :  { %p306_p8 = scmp.ne.s32.totalorder %s229_s26, 0 }
  0x89   :  { %233 = shalt.err (%p306_p8)  }

</bundles_post_ra>
